<compile_context>
chip_gen: v7x
topology: tpu7x:2x2x1
jax: 0.10.0
libtpu: 0.0.40
codegen_flags: <defaults>
</compile_context>

<pallas_src>
import math
import functools

import numpy as np
import jax
import jax.numpy as jnp
from jax.experimental import pallas as pl
from jax.experimental.pallas import tpu as pltpu

NUM_LEVELS = 3
POOL_TYPE = "max_pool"  # 'max_pool' or 'avg_pool', as in the torch module


def _pool_params(h, w, level):
    """Replicates the kernel/stride/padding/output-size math of the torch module."""
    kh, kw = math.ceil(h / level), math.ceil(w / level)
    sh, sw = kh, kw
    ph = (kh * level - h + 1) // 2   # math.floor of a non-negative value
    pw = (kw * level - w + 1) // 2
    oh = (h + 2 * ph - kh) // sh + 1  # F.max_pool2d output size formula (ceil_mode=False)
    ow = (w + 2 * pw - kw) // sw + 1
    return kh, kw, sh, sw, ph, pw, oh, ow


def _total_windows(h, w, num_levels):
    return sum(_pool_params(h, w, i + 1)[6] * _pool_params(h, w, i + 1)[7]
               for i in range(num_levels))


# --------------------------------------------------------------------------- #
# Max-pool kernel: elementwise maximum chains (VPU) + one dense store per step #
# --------------------------------------------------------------------------- #
def spp_max_kernel(x_ref, o_ref, *, num_levels, h, w):
    # x_ref: (1, H, W, Cb) VMEM block (channels-last); o_ref: (1, P, Cb), P = sum_l l^2.
    col = jax.lax.broadcasted_iota(jnp.int32, (w, 1), 0)  # (W, 1) column index
    rows = []
    for i in range(num_levels):
        level = i + 1
        kh, kw, sh, sw, ph, pw, oh, ow = _pool_params(h, w, level)
        for oy in range(oh):
            y0 = max(oy * sh - ph, 0)
            y1 = min(oy * sh - ph + kh, h)
            # Accumulate max over the window's H rows -> (W, Cb). Pure VPU work.
            # f32 accumulation also handles bf16 inputs cleanly on v5e.
            row_acc = x_ref[0, y0, :, :].astype(jnp.float32)
            for y in range(y0 + 1, y1):
                row_acc = jnp.maximum(row_acc, x_ref[0, y, :, :].astype(jnp.float32))
            for ox in range(ow):
                x0 = max(ox * sw - pw, 0)
                x1 = min(ox * sw - pw + kw, w)
                if x0 == 0 and x1 == w:
                    win = row_acc
                else:
                    # Mask instead of unaligned sublane slicing (torch pads with -inf,
                    # so masking to -inf outside the valid window is exact).
                    win = jnp.where((col >= x0) & (col < x1), row_acc, -jnp.inf)
                rows.append(jnp.max(win, axis=0, keepdims=True))  # (1, Cb)
    pooled = jnp.concatenate(rows, axis=0)                        # (P, Cb)
    o_ref[0] = pooled.astype(o_ref.dtype)                         # single lane-dense store


# --------------------------------------------------------------------------- #
# Avg-pool kernel: one MXU matmul with a constant pooling matrix               #
# --------------------------------------------------------------------------- #
def spp_avg_kernel(pm_ref, x_ref, o_ref, *, h, w):
    # pm_ref: (P, H*W) f32 pooling weights; x_ref: (1, H, W, Cb); o_ref: (1, P, Cb).
    cb = x_ref.shape[-1]
    x = x_ref[0].reshape(h * w, cb).astype(jnp.float32)           # (H*W, Cb)
    pooled = jnp.dot(pm_ref[...], x, preferred_element_type=jnp.float32)  # (P, Cb)
    o_ref[0] = pooled.astype(o_ref.dtype)


def _build_avg_pool_matrix(h, w, num_levels):
    """(P, H*W) matrix: row p holds 1/(kh*kw) on the valid window positions.
    count_include_pad=True => divide by full kernel area; padded zeros add 0."""
    rows = []
    for i in range(num_levels):
        level = i + 1
        kh, kw, sh, sw, ph, pw, oh, ow = _pool_params(h, w, level)
        inv = 1.0 / float(kh * kw)
        for oy in range(oh):
            y0 = max(oy * sh - ph, 0)
            y1 = min(oy * sh - ph + kh, h)
            for ox in range(ow):
                x0 = max(ox * sw - pw, 0)
                x1 = min(ox * sw - pw + kw, w)
                m = np.zeros((h, w), np.float32)
                m[y0:y1, x0:x1] = inv
                rows.append(m.reshape(-1))
    return jnp.asarray(np.stack(rows, axis=0))


def _pick_c_block(c):
    # Channel tiling only when C is lane-aligned; keeps v7x VMEM happy and gives
    # extra parallel grid iterations for its 2 TensorCores.
    if c % 128 != 0:
        return c
    for cb in (512, 256, 128):
        if c % cb == 0:
            return min(cb, c)
    return c


def spp_layer(x, num_levels=NUM_LEVELS, pool_type=POOL_TYPE):
    n, c, h, w = x.shape
    p_total = _total_windows(h, w, num_levels)
    cb = _pick_c_block(c)

    # Layout plumbing (not compute): channels-last so C sits on the lane axis.
    x_nhwc = jnp.transpose(x, (0, 2, 3, 1))  # (N, H, W, C)

    grid = (n, c // cb)
    x_spec = pl.BlockSpec((1, h, w, cb), lambda b, j: (b, 0, 0, j))
    out_spec = pl.BlockSpec((1, p_total, cb), lambda b, j: (b, 0, j))
    out_shape = jax.ShapeDtypeStruct((n, p_total, c), x.dtype)
    cparams = pltpu.CompilerParams(dimension_semantics=("parallel", "parallel"))

    if pool_type == "max_pool":
        kernel = functools.partial(spp_max_kernel, num_levels=num_levels, h=h, w=w)
        out = pl.pallas_call(
            kernel,
            out_shape=out_shape,
            grid=grid,
            in_specs=[x_spec],
            out_specs=out_spec,
            compiler_params=cparams,
        )(x_nhwc)
    else:
        pm = _build_avg_pool_matrix(h, w, num_levels)  # (P, H*W) f32 constant
        pm_spec = pl.BlockSpec((p_total, h * w), lambda b, j: (0, 0))
        kernel = functools.partial(spp_avg_kernel, h=h, w=w)
        out = pl.pallas_call(
            kernel,
            out_shape=out_shape,
            grid=grid,
            in_specs=[pm_spec, x_spec],
            out_specs=out_spec,
            compiler_params=cparams,
        )(pm, x_nhwc)

    # torch: pooled (n, c, oh, ow).view(n, -1) flattens channel-major, then oy, ox;
    # levels are concatenated along dim 1.  Reorder the (n, P, C) kernel output.
    flats = []
    off = 0
    for i in range(num_levels):
        level = i + 1
        *_, oh, ow = _pool_params(h, w, level)
        blk = out[:, off:off + oh * ow, :]                       # (n, oh*ow, c)
        flats.append(jnp.transpose(blk, (0, 2, 1)).reshape(n, -1))
        off += oh * ow
    return jnp.concatenate(flats, axis=1)


# --------------------------------------------------------------------------- #
# Pure-JAX reference mirroring F.max_pool2d / F.avg_pool2d semantics           #
# --------------------------------------------------------------------------- #
def spp_reference(x, num_levels=NUM_LEVELS, pool_type=POOL_TYPE):
    n, c, h, w = x.shape
    flats = []
    for i in range(num_levels):
        level = i + 1
        kh, kw, sh, sw, ph, pw, _, _ = _pool_params(h, w, level)
        if pool_type == "max_pool":
            padded = jnp.pad(
                x, ((0, 0), (0, 0), (ph, ph), (pw, pw)), constant_values=-jnp.inf,
            )
            pooled = jax.lax.reduce_window(
                padded, -jnp.inf, jax.lax.max,
                (1, 1, kh, kw), (1, 1, sh, sw), "VALID",
            )
        else:
            padded = jnp.pad(x, ((0, 0), (0, 0), (ph, ph), (pw, pw)))
            pooled = jax.lax.reduce_window(
                padded, 0.0, jax.lax.add,
                (1, 1, kh, kw), (1, 1, sh, sw), "VALID",
            ) / float(kh * kw)
        flats.append(pooled.reshape(n, -1))
    return jnp.concatenate(flats, axis=1)


if __name__ == "__main__":
    key = jax.random.PRNGKey(0)
    # Small shapes consistent with the module: N=2, C=4, H=W=16.
    x = jax.random.normal(key, (2, 4, 16, 16), dtype=jnp.float32)

    p_total = _total_windows(16, 16, NUM_LEVELS)  # 1 + 4 + 9 = 14

    out_max = jax.block_until_ready(spp_layer(x, NUM_LEVELS, "max_pool"))
    ref_max = spp_reference(x, NUM_LEVELS, "max_pool")
    assert out_max.shape == (2, 4 * p_total)
    assert jnp.allclose(out_max, ref_max, atol=1e-5, rtol=1e-5)

    out_avg = jax.block_until_ready(spp_layer(x, NUM_LEVELS, "avg_pool"))
    ref_avg = spp_reference(x, NUM_LEVELS, "avg_pool")
    assert out_avg.shape == (2, 4 * p_total)
    assert jnp.allclose(out_avg, ref_avg, atol=1e-5, rtol=1e-5)

    print("KERNEL_OK")
</pallas_src>

<mosaic_0001>
module attributes {stable_mosaic.version = 11 : i64} {
  func.func @spp_max_kernel(%arg0: i32, %arg1: i32, %arg2: memref<1x16x16x4xf32, #tpu.memory_space<vmem>>, %arg3: memref<1x14x4xf32, #tpu.memory_space<vmem>>) attributes {dimension_semantics = [#tpu.dimension_semantics<parallel>, #tpu.dimension_semantics<parallel>], iteration_bounds = array<i64: 2, 1>, scalar_prefetch = 0 : i64, scratch_operands = 0 : i64, tpu.core_type = #tpu.core_type<tc>, window_params = [{transform_indices = @transform_0, window_bounds = array<i64: 1, 16, 16, 4>}, {transform_indices = @transform_1, window_bounds = array<i64: 1, 14, 4>}]} {
    %0 = tpu.iota {dimensions = array<i32: 0>} : vector<16x1xi32>
    %c0 = arith.constant 0 : index
    %c0_0 = arith.constant 0 : index
    %c0_1 = arith.constant 0 : index
    %c0_2 = arith.constant 0 : index
    %1 = vector.load %arg2[%c0, %c0_0, %c0_1, %c0_2] : memref<1x16x16x4xf32, #tpu.memory_space<vmem>>, vector<1x1x16x4xf32>
    %2 = vector.shape_cast %1 : vector<1x1x16x4xf32> to vector<16x4xf32>
    %c0_3 = arith.constant 0 : index
    %c1 = arith.constant 1 : index
    %c0_4 = arith.constant 0 : index
    %c0_5 = arith.constant 0 : index
    %3 = vector.load %arg2[%c0_3, %c1, %c0_4, %c0_5] : memref<1x16x16x4xf32, #tpu.memory_space<vmem>>, vector<1x1x16x4xf32>
    %4 = vector.shape_cast %3 : vector<1x1x16x4xf32> to vector<16x4xf32>
    %5 = arith.maximumf %2, %4 : vector<16x4xf32>
    %c0_6 = arith.constant 0 : index
    %c2 = arith.constant 2 : index
    %c0_7 = arith.constant 0 : index
    %c0_8 = arith.constant 0 : index
    %6 = vector.load %arg2[%c0_6, %c2, %c0_7, %c0_8] : memref<1x16x16x4xf32, #tpu.memory_space<vmem>>, vector<1x1x16x4xf32>
    %7 = vector.shape_cast %6 : vector<1x1x16x4xf32> to vector<16x4xf32>
    %8 = arith.maximumf %5, %7 : vector<16x4xf32>
    %c0_9 = arith.constant 0 : index
    %c3 = arith.constant 3 : index
    %c0_10 = arith.constant 0 : index
    %c0_11 = arith.constant 0 : index
    %9 = vector.load %arg2[%c0_9, %c3, %c0_10, %c0_11] : memref<1x16x16x4xf32, #tpu.memory_space<vmem>>, vector<1x1x16x4xf32>
    %10 = vector.shape_cast %9 : vector<1x1x16x4xf32> to vector<16x4xf32>
    %11 = arith.maximumf %8, %10 : vector<16x4xf32>
    %c0_12 = arith.constant 0 : index
    %c4 = arith.constant 4 : index
    %c0_13 = arith.constant 0 : index
    %c0_14 = arith.constant 0 : index
    %12 = vector.load %arg2[%c0_12, %c4, %c0_13, %c0_14] : memref<1x16x16x4xf32, #tpu.memory_space<vmem>>, vector<1x1x16x4xf32>
    %13 = vector.shape_cast %12 : vector<1x1x16x4xf32> to vector<16x4xf32>
    %14 = arith.maximumf %11, %13 : vector<16x4xf32>
    %c0_15 = arith.constant 0 : index
    %c5 = arith.constant 5 : index
    %c0_16 = arith.constant 0 : index
    %c0_17 = arith.constant 0 : index
    %15 = vector.load %arg2[%c0_15, %c5, %c0_16, %c0_17] : memref<1x16x16x4xf32, #tpu.memory_space<vmem>>, vector<1x1x16x4xf32>
    %16 = vector.shape_cast %15 : vector<1x1x16x4xf32> to vector<16x4xf32>
    %17 = arith.maximumf %14, %16 : vector<16x4xf32>
    %c0_18 = arith.constant 0 : index
    %c6 = arith.constant 6 : index
    %c0_19 = arith.constant 0 : index
    %c0_20 = arith.constant 0 : index
    %18 = vector.load %arg2[%c0_18, %c6, %c0_19, %c0_20] : memref<1x16x16x4xf32, #tpu.memory_space<vmem>>, vector<1x1x16x4xf32>
    %19 = vector.shape_cast %18 : vector<1x1x16x4xf32> to vector<16x4xf32>
    %20 = arith.maximumf %17, %19 : vector<16x4xf32>
    %c0_21 = arith.constant 0 : index
    %c7 = arith.constant 7 : index
    %c0_22 = arith.constant 0 : index
    %c0_23 = arith.constant 0 : index
    %21 = vector.load %arg2[%c0_21, %c7, %c0_22, %c0_23] : memref<1x16x16x4xf32, #tpu.memory_space<vmem>>, vector<1x1x16x4xf32>
    %22 = vector.shape_cast %21 : vector<1x1x16x4xf32> to vector<16x4xf32>
    %23 = arith.maximumf %20, %22 : vector<16x4xf32>
    %c0_24 = arith.constant 0 : index
    %c8 = arith.constant 8 : index
    %c0_25 = arith.constant 0 : index
    %c0_26 = arith.constant 0 : index
    %24 = vector.load %arg2[%c0_24, %c8, %c0_25, %c0_26] : memref<1x16x16x4xf32, #tpu.memory_space<vmem>>, vector<1x1x16x4xf32>
    %25 = vector.shape_cast %24 : vector<1x1x16x4xf32> to vector<16x4xf32>
    %26 = arith.maximumf %23, %25 : vector<16x4xf32>
    %c0_27 = arith.constant 0 : index
    %c9 = arith.constant 9 : index
    %c0_28 = arith.constant 0 : index
    %c0_29 = arith.constant 0 : index
    %27 = vector.load %arg2[%c0_27, %c9, %c0_28, %c0_29] : memref<1x16x16x4xf32, #tpu.memory_space<vmem>>, vector<1x1x16x4xf32>
    %28 = vector.shape_cast %27 : vector<1x1x16x4xf32> to vector<16x4xf32>
    %29 = arith.maximumf %26, %28 : vector<16x4xf32>
    %c0_30 = arith.constant 0 : index
    %c10 = arith.constant 10 : index
    %c0_31 = arith.constant 0 : index
    %c0_32 = arith.constant 0 : index
    %30 = vector.load %arg2[%c0_30, %c10, %c0_31, %c0_32] : memref<1x16x16x4xf32, #tpu.memory_space<vmem>>, vector<1x1x16x4xf32>
    %31 = vector.shape_cast %30 : vector<1x1x16x4xf32> to vector<16x4xf32>
    %32 = arith.maximumf %29, %31 : vector<16x4xf32>
    %c0_33 = arith.constant 0 : index
    %c11 = arith.constant 11 : index
    %c0_34 = arith.constant 0 : index
    %c0_35 = arith.constant 0 : index
    %33 = vector.load %arg2[%c0_33, %c11, %c0_34, %c0_35] : memref<1x16x16x4xf32, #tpu.memory_space<vmem>>, vector<1x1x16x4xf32>
    %34 = vector.shape_cast %33 : vector<1x1x16x4xf32> to vector<16x4xf32>
    %35 = arith.maximumf %32, %34 : vector<16x4xf32>
    %c0_36 = arith.constant 0 : index
    %c12 = arith.constant 12 : index
    %c0_37 = arith.constant 0 : index
    %c0_38 = arith.constant 0 : index
    %36 = vector.load %arg2[%c0_36, %c12, %c0_37, %c0_38] : memref<1x16x16x4xf32, #tpu.memory_space<vmem>>, vector<1x1x16x4xf32>
    %37 = vector.shape_cast %36 : vector<1x1x16x4xf32> to vector<16x4xf32>
    %38 = arith.maximumf %35, %37 : vector<16x4xf32>
    %c0_39 = arith.constant 0 : index
    %c13 = arith.constant 13 : index
    %c0_40 = arith.constant 0 : index
    %c0_41 = arith.constant 0 : index
    %39 = vector.load %arg2[%c0_39, %c13, %c0_40, %c0_41] : memref<1x16x16x4xf32, #tpu.memory_space<vmem>>, vector<1x1x16x4xf32>
    %40 = vector.shape_cast %39 : vector<1x1x16x4xf32> to vector<16x4xf32>
    %41 = arith.maximumf %38, %40 : vector<16x4xf32>
    %c0_42 = arith.constant 0 : index
    %c14 = arith.constant 14 : index
    %c0_43 = arith.constant 0 : index
    %c0_44 = arith.constant 0 : index
    %42 = vector.load %arg2[%c0_42, %c14, %c0_43, %c0_44] : memref<1x16x16x4xf32, #tpu.memory_space<vmem>>, vector<1x1x16x4xf32>
    %43 = vector.shape_cast %42 : vector<1x1x16x4xf32> to vector<16x4xf32>
    %44 = arith.maximumf %41, %43 : vector<16x4xf32>
    %c0_45 = arith.constant 0 : index
    %c15 = arith.constant 15 : index
    %c0_46 = arith.constant 0 : index
    %c0_47 = arith.constant 0 : index
    %45 = vector.load %arg2[%c0_45, %c15, %c0_46, %c0_47] : memref<1x16x16x4xf32, #tpu.memory_space<vmem>>, vector<1x1x16x4xf32>
    %46 = vector.shape_cast %45 : vector<1x1x16x4xf32> to vector<16x4xf32>
    %47 = arith.maximumf %44, %46 : vector<16x4xf32>
    %cst = arith.constant dense<0xFF800000> : vector<4xf32>
    %48 = vector.multi_reduction <maximumf>, %47, %cst [0] : vector<16x4xf32> to vector<4xf32>
    %49 = vector.shape_cast %48 : vector<4xf32> to vector<1x4xf32>
    %c0_48 = arith.constant 0 : index
    %c0_49 = arith.constant 0 : index
    %c0_50 = arith.constant 0 : index
    %c0_51 = arith.constant 0 : index
    %50 = vector.load %arg2[%c0_48, %c0_49, %c0_50, %c0_51] : memref<1x16x16x4xf32, #tpu.memory_space<vmem>>, vector<1x1x16x4xf32>
    %51 = vector.shape_cast %50 : vector<1x1x16x4xf32> to vector<16x4xf32>
    %c0_52 = arith.constant 0 : index
    %c1_53 = arith.constant 1 : index
    %c0_54 = arith.constant 0 : index
    %c0_55 = arith.constant 0 : index
    %52 = vector.load %arg2[%c0_52, %c1_53, %c0_54, %c0_55] : memref<1x16x16x4xf32, #tpu.memory_space<vmem>>, vector<1x1x16x4xf32>
    %53 = vector.shape_cast %52 : vector<1x1x16x4xf32> to vector<16x4xf32>
    %54 = arith.maximumf %51, %53 : vector<16x4xf32>
    %c0_56 = arith.constant 0 : index
    %c2_57 = arith.constant 2 : index
    %c0_58 = arith.constant 0 : index
    %c0_59 = arith.constant 0 : index
    %55 = vector.load %arg2[%c0_56, %c2_57, %c0_58, %c0_59] : memref<1x16x16x4xf32, #tpu.memory_space<vmem>>, vector<1x1x16x4xf32>
    %56 = vector.shape_cast %55 : vector<1x1x16x4xf32> to vector<16x4xf32>
    %57 = arith.maximumf %54, %56 : vector<16x4xf32>
    %c0_60 = arith.constant 0 : index
    %c3_61 = arith.constant 3 : index
    %c0_62 = arith.constant 0 : index
    %c0_63 = arith.constant 0 : index
    %58 = vector.load %arg2[%c0_60, %c3_61, %c0_62, %c0_63] : memref<1x16x16x4xf32, #tpu.memory_space<vmem>>, vector<1x1x16x4xf32>
    %59 = vector.shape_cast %58 : vector<1x1x16x4xf32> to vector<16x4xf32>
    %60 = arith.maximumf %57, %59 : vector<16x4xf32>
    %c0_64 = arith.constant 0 : index
    %c4_65 = arith.constant 4 : index
    %c0_66 = arith.constant 0 : index
    %c0_67 = arith.constant 0 : index
    %61 = vector.load %arg2[%c0_64, %c4_65, %c0_66, %c0_67] : memref<1x16x16x4xf32, #tpu.memory_space<vmem>>, vector<1x1x16x4xf32>
    %62 = vector.shape_cast %61 : vector<1x1x16x4xf32> to vector<16x4xf32>
    %63 = arith.maximumf %60, %62 : vector<16x4xf32>
    %c0_68 = arith.constant 0 : index
    %c5_69 = arith.constant 5 : index
    %c0_70 = arith.constant 0 : index
    %c0_71 = arith.constant 0 : index
    %64 = vector.load %arg2[%c0_68, %c5_69, %c0_70, %c0_71] : memref<1x16x16x4xf32, #tpu.memory_space<vmem>>, vector<1x1x16x4xf32>
    %65 = vector.shape_cast %64 : vector<1x1x16x4xf32> to vector<16x4xf32>
    %66 = arith.maximumf %63, %65 : vector<16x4xf32>
    %c0_72 = arith.constant 0 : index
    %c6_73 = arith.constant 6 : index
    %c0_74 = arith.constant 0 : index
    %c0_75 = arith.constant 0 : index
    %67 = vector.load %arg2[%c0_72, %c6_73, %c0_74, %c0_75] : memref<1x16x16x4xf32, #tpu.memory_space<vmem>>, vector<1x1x16x4xf32>
    %68 = vector.shape_cast %67 : vector<1x1x16x4xf32> to vector<16x4xf32>
    %69 = arith.maximumf %66, %68 : vector<16x4xf32>
    %c0_76 = arith.constant 0 : index
    %c7_77 = arith.constant 7 : index
    %c0_78 = arith.constant 0 : index
    %c0_79 = arith.constant 0 : index
    %70 = vector.load %arg2[%c0_76, %c7_77, %c0_78, %c0_79] : memref<1x16x16x4xf32, #tpu.memory_space<vmem>>, vector<1x1x16x4xf32>
    %71 = vector.shape_cast %70 : vector<1x1x16x4xf32> to vector<16x4xf32>
    %72 = arith.maximumf %69, %71 : vector<16x4xf32>
    %c0_i32 = arith.constant 0 : i32
    %73 = vector.broadcast %c0_i32 : i32 to vector<16x1xi32>
    %74 = arith.cmpi sge, %0, %73 : vector<16x1xi32>
    %c8_i32 = arith.constant 8 : i32
    %75 = vector.broadcast %c8_i32 : i32 to vector<16x1xi32>
    %76 = arith.cmpi slt, %0, %75 : vector<16x1xi32>
    %77 = arith.andi %74, %76 : vector<16x1xi1>
    %cst_80 = arith.constant 0xFF800000 : f32
    %78 = vector.shape_cast %77 : vector<16x1xi1> to vector<16x1xi1>
    %79 = vector.broadcast %78 : vector<16x1xi1> to vector<16x4xi1>
    %80 = vector.broadcast %cst_80 : f32 to vector<16x4xf32>
    %81 = arith.select %79, %72, %80 : vector<16x4xi1>, vector<16x4xf32>
    %cst_81 = arith.constant dense<0xFF800000> : vector<4xf32>
    %82 = vector.multi_reduction <maximumf>, %81, %cst_81 [0] : vector<16x4xf32> to vector<4xf32>
    %83 = vector.shape_cast %82 : vector<4xf32> to vector<1x4xf32>
    %c8_i32_82 = arith.constant 8 : i32
    %84 = vector.broadcast %c8_i32_82 : i32 to vector<16x1xi32>
    %85 = arith.cmpi sge, %0, %84 : vector<16x1xi32>
    %c16_i32 = arith.constant 16 : i32
    %86 = vector.broadcast %c16_i32 : i32 to vector<16x1xi32>
    %87 = arith.cmpi slt, %0, %86 : vector<16x1xi32>
    %88 = arith.andi %85, %87 : vector<16x1xi1>
    %cst_83 = arith.constant 0xFF800000 : f32
    %89 = vector.shape_cast %88 : vector<16x1xi1> to vector<16x1xi1>
    %90 = vector.broadcast %89 : vector<16x1xi1> to vector<16x4xi1>
    %91 = vector.broadcast %cst_83 : f32 to vector<16x4xf32>
    %92 = arith.select %90, %72, %91 : vector<16x4xi1>, vector<16x4xf32>
    %cst_84 = arith.constant dense<0xFF800000> : vector<4xf32>
    %93 = vector.multi_reduction <maximumf>, %92, %cst_84 [0] : vector<16x4xf32> to vector<4xf32>
    %94 = vector.shape_cast %93 : vector<4xf32> to vector<1x4xf32>
    %c0_85 = arith.constant 0 : index
    %c8_86 = arith.constant 8 : index
    %c0_87 = arith.constant 0 : index
    %c0_88 = arith.constant 0 : index
    %95 = vector.load %arg2[%c0_85, %c8_86, %c0_87, %c0_88] : memref<1x16x16x4xf32, #tpu.memory_space<vmem>>, vector<1x1x16x4xf32>
    %96 = vector.shape_cast %95 : vector<1x1x16x4xf32> to vector<16x4xf32>
    %c0_89 = arith.constant 0 : index
    %c9_90 = arith.constant 9 : index
    %c0_91 = arith.constant 0 : index
    %c0_92 = arith.constant 0 : index
    %97 = vector.load %arg2[%c0_89, %c9_90, %c0_91, %c0_92] : memref<1x16x16x4xf32, #tpu.memory_space<vmem>>, vector<1x1x16x4xf32>
    %98 = vector.shape_cast %97 : vector<1x1x16x4xf32> to vector<16x4xf32>
    %99 = arith.maximumf %96, %98 : vector<16x4xf32>
    %c0_93 = arith.constant 0 : index
    %c10_94 = arith.constant 10 : index
    %c0_95 = arith.constant 0 : index
    %c0_96 = arith.constant 0 : index
    %100 = vector.load %arg2[%c0_93, %c10_94, %c0_95, %c0_96] : memref<1x16x16x4xf32, #tpu.memory_space<vmem>>, vector<1x1x16x4xf32>
    %101 = vector.shape_cast %100 : vector<1x1x16x4xf32> to vector<16x4xf32>
    %102 = arith.maximumf %99, %101 : vector<16x4xf32>
    %c0_97 = arith.constant 0 : index
    %c11_98 = arith.constant 11 : index
    %c0_99 = arith.constant 0 : index
    %c0_100 = arith.constant 0 : index
    %103 = vector.load %arg2[%c0_97, %c11_98, %c0_99, %c0_100] : memref<1x16x16x4xf32, #tpu.memory_space<vmem>>, vector<1x1x16x4xf32>
    %104 = vector.shape_cast %103 : vector<1x1x16x4xf32> to vector<16x4xf32>
    %105 = arith.maximumf %102, %104 : vector<16x4xf32>
    %c0_101 = arith.constant 0 : index
    %c12_102 = arith.constant 12 : index
    %c0_103 = arith.constant 0 : index
    %c0_104 = arith.constant 0 : index
    %106 = vector.load %arg2[%c0_101, %c12_102, %c0_103, %c0_104] : memref<1x16x16x4xf32, #tpu.memory_space<vmem>>, vector<1x1x16x4xf32>
    %107 = vector.shape_cast %106 : vector<1x1x16x4xf32> to vector<16x4xf32>
    %108 = arith.maximumf %105, %107 : vector<16x4xf32>
    %c0_105 = arith.constant 0 : index
    %c13_106 = arith.constant 13 : index
    %c0_107 = arith.constant 0 : index
    %c0_108 = arith.constant 0 : index
    %109 = vector.load %arg2[%c0_105, %c13_106, %c0_107, %c0_108] : memref<1x16x16x4xf32, #tpu.memory_space<vmem>>, vector<1x1x16x4xf32>
    %110 = vector.shape_cast %109 : vector<1x1x16x4xf32> to vector<16x4xf32>
    %111 = arith.maximumf %108, %110 : vector<16x4xf32>
    %c0_109 = arith.constant 0 : index
    %c14_110 = arith.constant 14 : index
    %c0_111 = arith.constant 0 : index
    %c0_112 = arith.constant 0 : index
    %112 = vector.load %arg2[%c0_109, %c14_110, %c0_111, %c0_112] : memref<1x16x16x4xf32, #tpu.memory_space<vmem>>, vector<1x1x16x4xf32>
    %113 = vector.shape_cast %112 : vector<1x1x16x4xf32> to vector<16x4xf32>
    %114 = arith.maximumf %111, %113 : vector<16x4xf32>
    %c0_113 = arith.constant 0 : index
    %c15_114 = arith.constant 15 : index
    %c0_115 = arith.constant 0 : index
    %c0_116 = arith.constant 0 : index
    %115 = vector.load %arg2[%c0_113, %c15_114, %c0_115, %c0_116] : memref<1x16x16x4xf32, #tpu.memory_space<vmem>>, vector<1x1x16x4xf32>
    %116 = vector.shape_cast %115 : vector<1x1x16x4xf32> to vector<16x4xf32>
    %117 = arith.maximumf %114, %116 : vector<16x4xf32>
    %c0_i32_117 = arith.constant 0 : i32
    %118 = vector.broadcast %c0_i32_117 : i32 to vector<16x1xi32>
    %119 = arith.cmpi sge, %0, %118 : vector<16x1xi32>
    %c8_i32_118 = arith.constant 8 : i32
    %120 = vector.broadcast %c8_i32_118 : i32 to vector<16x1xi32>
    %121 = arith.cmpi slt, %0, %120 : vector<16x1xi32>
    %122 = arith.andi %119, %121 : vector<16x1xi1>
    %cst_119 = arith.constant 0xFF800000 : f32
    %123 = vector.shape_cast %122 : vector<16x1xi1> to vector<16x1xi1>
    %124 = vector.broadcast %123 : vector<16x1xi1> to vector<16x4xi1>
    %125 = vector.broadcast %cst_119 : f32 to vector<16x4xf32>
    %126 = arith.select %124, %117, %125 : vector<16x4xi1>, vector<16x4xf32>
    %cst_120 = arith.constant dense<0xFF800000> : vector<4xf32>
    %127 = vector.multi_reduction <maximumf>, %126, %cst_120 [0] : vector<16x4xf32> to vector<4xf32>
    %128 = vector.shape_cast %127 : vector<4xf32> to vector<1x4xf32>
    %c8_i32_121 = arith.constant 8 : i32
    %129 = vector.broadcast %c8_i32_121 : i32 to vector<16x1xi32>
    %130 = arith.cmpi sge, %0, %129 : vector<16x1xi32>
    %c16_i32_122 = arith.constant 16 : i32
    %131 = vector.broadcast %c16_i32_122 : i32 to vector<16x1xi32>
    %132 = arith.cmpi slt, %0, %131 : vector<16x1xi32>
    %133 = arith.andi %130, %132 : vector<16x1xi1>
    %cst_123 = arith.constant 0xFF800000 : f32
    %134 = vector.shape_cast %133 : vector<16x1xi1> to vector<16x1xi1>
    %135 = vector.broadcast %134 : vector<16x1xi1> to vector<16x4xi1>
    %136 = vector.broadcast %cst_123 : f32 to vector<16x4xf32>
    %137 = arith.select %135, %117, %136 : vector<16x4xi1>, vector<16x4xf32>
    %cst_124 = arith.constant dense<0xFF800000> : vector<4xf32>
    %138 = vector.multi_reduction <maximumf>, %137, %cst_124 [0] : vector<16x4xf32> to vector<4xf32>
    %139 = vector.shape_cast %138 : vector<4xf32> to vector<1x4xf32>
    %c0_125 = arith.constant 0 : index
    %c0_126 = arith.constant 0 : index
    %c0_127 = arith.constant 0 : index
    %c0_128 = arith.constant 0 : index
    %140 = vector.load %arg2[%c0_125, %c0_126, %c0_127, %c0_128] : memref<1x16x16x4xf32, #tpu.memory_space<vmem>>, vector<1x1x16x4xf32>
    %141 = vector.shape_cast %140 : vector<1x1x16x4xf32> to vector<16x4xf32>
    %c0_129 = arith.constant 0 : index
    %c1_130 = arith.constant 1 : index
    %c0_131 = arith.constant 0 : index
    %c0_132 = arith.constant 0 : index
    %142 = vector.load %arg2[%c0_129, %c1_130, %c0_131, %c0_132] : memref<1x16x16x4xf32, #tpu.memory_space<vmem>>, vector<1x1x16x4xf32>
    %143 = vector.shape_cast %142 : vector<1x1x16x4xf32> to vector<16x4xf32>
    %144 = arith.maximumf %141, %143 : vector<16x4xf32>
    %c0_133 = arith.constant 0 : index
    %c2_134 = arith.constant 2 : index
    %c0_135 = arith.constant 0 : index
    %c0_136 = arith.constant 0 : index
    %145 = vector.load %arg2[%c0_133, %c2_134, %c0_135, %c0_136] : memref<1x16x16x4xf32, #tpu.memory_space<vmem>>, vector<1x1x16x4xf32>
    %146 = vector.shape_cast %145 : vector<1x1x16x4xf32> to vector<16x4xf32>
    %147 = arith.maximumf %144, %146 : vector<16x4xf32>
    %c0_137 = arith.constant 0 : index
    %c3_138 = arith.constant 3 : index
    %c0_139 = arith.constant 0 : index
    %c0_140 = arith.constant 0 : index
    %148 = vector.load %arg2[%c0_137, %c3_138, %c0_139, %c0_140] : memref<1x16x16x4xf32, #tpu.memory_space<vmem>>, vector<1x1x16x4xf32>
    %149 = vector.shape_cast %148 : vector<1x1x16x4xf32> to vector<16x4xf32>
    %150 = arith.maximumf %147, %149 : vector<16x4xf32>
    %c0_141 = arith.constant 0 : index
    %c4_142 = arith.constant 4 : index
    %c0_143 = arith.constant 0 : index
    %c0_144 = arith.constant 0 : index
    %151 = vector.load %arg2[%c0_141, %c4_142, %c0_143, %c0_144] : memref<1x16x16x4xf32, #tpu.memory_space<vmem>>, vector<1x1x16x4xf32>
    %152 = vector.shape_cast %151 : vector<1x1x16x4xf32> to vector<16x4xf32>
    %153 = arith.maximumf %150, %152 : vector<16x4xf32>
    %c0_i32_145 = arith.constant 0 : i32
    %154 = vector.broadcast %c0_i32_145 : i32 to vector<16x1xi32>
    %155 = arith.cmpi sge, %0, %154 : vector<16x1xi32>
    %c5_i32 = arith.constant 5 : i32
    %156 = vector.broadcast %c5_i32 : i32 to vector<16x1xi32>
    %157 = arith.cmpi slt, %0, %156 : vector<16x1xi32>
    %158 = arith.andi %155, %157 : vector<16x1xi1>
    %cst_146 = arith.constant 0xFF800000 : f32
    %159 = vector.shape_cast %158 : vector<16x1xi1> to vector<16x1xi1>
    %160 = vector.broadcast %159 : vector<16x1xi1> to vector<16x4xi1>
    %161 = vector.broadcast %cst_146 : f32 to vector<16x4xf32>
    %162 = arith.select %160, %153, %161 : vector<16x4xi1>, vector<16x4xf32>
    %cst_147 = arith.constant dense<0xFF800000> : vector<4xf32>
    %163 = vector.multi_reduction <maximumf>, %162, %cst_147 [0] : vector<16x4xf32> to vector<4xf32>
    %164 = vector.shape_cast %163 : vector<4xf32> to vector<1x4xf32>
    %c5_i32_148 = arith.constant 5 : i32
    %165 = vector.broadcast %c5_i32_148 : i32 to vector<16x1xi32>
    %166 = arith.cmpi sge, %0, %165 : vector<16x1xi32>
    %c11_i32 = arith.constant 11 : i32
    %167 = vector.broadcast %c11_i32 : i32 to vector<16x1xi32>
    %168 = arith.cmpi slt, %0, %167 : vector<16x1xi32>
    %169 = arith.andi %166, %168 : vector<16x1xi1>
    %cst_149 = arith.constant 0xFF800000 : f32
    %170 = vector.shape_cast %169 : vector<16x1xi1> to vector<16x1xi1>
    %171 = vector.broadcast %170 : vector<16x1xi1> to vector<16x4xi1>
    %172 = vector.broadcast %cst_149 : f32 to vector<16x4xf32>
    %173 = arith.select %171, %153, %172 : vector<16x4xi1>, vector<16x4xf32>
    %cst_150 = arith.constant dense<0xFF800000> : vector<4xf32>
    %174 = vector.multi_reduction <maximumf>, %173, %cst_150 [0] : vector<16x4xf32> to vector<4xf32>
    %175 = vector.shape_cast %174 : vector<4xf32> to vector<1x4xf32>
    %c11_i32_151 = arith.constant 11 : i32
    %176 = vector.broadcast %c11_i32_151 : i32 to vector<16x1xi32>
    %177 = arith.cmpi sge, %0, %176 : vector<16x1xi32>
    %c16_i32_152 = arith.constant 16 : i32
    %178 = vector.broadcast %c16_i32_152 : i32 to vector<16x1xi32>
    %179 = arith.cmpi slt, %0, %178 : vector<16x1xi32>
    %180 = arith.andi %177, %179 : vector<16x1xi1>
    %cst_153 = arith.constant 0xFF800000 : f32
    %181 = vector.shape_cast %180 : vector<16x1xi1> to vector<16x1xi1>
    %182 = vector.broadcast %181 : vector<16x1xi1> to vector<16x4xi1>
    %183 = vector.broadcast %cst_153 : f32 to vector<16x4xf32>
    %184 = arith.select %182, %153, %183 : vector<16x4xi1>, vector<16x4xf32>
    %cst_154 = arith.constant dense<0xFF800000> : vector<4xf32>
    %185 = vector.multi_reduction <maximumf>, %184, %cst_154 [0] : vector<16x4xf32> to vector<4xf32>
    %186 = vector.shape_cast %185 : vector<4xf32> to vector<1x4xf32>
    %c0_155 = arith.constant 0 : index
    %c5_156 = arith.constant 5 : index
    %c0_157 = arith.constant 0 : index
    %c0_158 = arith.constant 0 : index
    %187 = vector.load %arg2[%c0_155, %c5_156, %c0_157, %c0_158] : memref<1x16x16x4xf32, #tpu.memory_space<vmem>>, vector<1x1x16x4xf32>
    %188 = vector.shape_cast %187 : vector<1x1x16x4xf32> to vector<16x4xf32>
    %c0_159 = arith.constant 0 : index
    %c6_160 = arith.constant 6 : index
    %c0_161 = arith.constant 0 : index
    %c0_162 = arith.constant 0 : index
    %189 = vector.load %arg2[%c0_159, %c6_160, %c0_161, %c0_162] : memref<1x16x16x4xf32, #tpu.memory_space<vmem>>, vector<1x1x16x4xf32>
    %190 = vector.shape_cast %189 : vector<1x1x16x4xf32> to vector<16x4xf32>
    %191 = arith.maximumf %188, %190 : vector<16x4xf32>
    %c0_163 = arith.constant 0 : index
    %c7_164 = arith.constant 7 : index
    %c0_165 = arith.constant 0 : index
    %c0_166 = arith.constant 0 : index
    %192 = vector.load %arg2[%c0_163, %c7_164, %c0_165, %c0_166] : memref<1x16x16x4xf32, #tpu.memory_space<vmem>>, vector<1x1x16x4xf32>
    %193 = vector.shape_cast %192 : vector<1x1x16x4xf32> to vector<16x4xf32>
    %194 = arith.maximumf %191, %193 : vector<16x4xf32>
    %c0_167 = arith.constant 0 : index
    %c8_168 = arith.constant 8 : index
    %c0_169 = arith.constant 0 : index
    %c0_170 = arith.constant 0 : index
    %195 = vector.load %arg2[%c0_167, %c8_168, %c0_169, %c0_170] : memref<1x16x16x4xf32, #tpu.memory_space<vmem>>, vector<1x1x16x4xf32>
    %196 = vector.shape_cast %195 : vector<1x1x16x4xf32> to vector<16x4xf32>
    %197 = arith.maximumf %194, %196 : vector<16x4xf32>
    %c0_171 = arith.constant 0 : index
    %c9_172 = arith.constant 9 : index
    %c0_173 = arith.constant 0 : index
    %c0_174 = arith.constant 0 : index
    %198 = vector.load %arg2[%c0_171, %c9_172, %c0_173, %c0_174] : memref<1x16x16x4xf32, #tpu.memory_space<vmem>>, vector<1x1x16x4xf32>
    %199 = vector.shape_cast %198 : vector<1x1x16x4xf32> to vector<16x4xf32>
    %200 = arith.maximumf %197, %199 : vector<16x4xf32>
    %c0_175 = arith.constant 0 : index
    %c10_176 = arith.constant 10 : index
    %c0_177 = arith.constant 0 : index
    %c0_178 = arith.constant 0 : index
    %201 = vector.load %arg2[%c0_175, %c10_176, %c0_177, %c0_178] : memref<1x16x16x4xf32, #tpu.memory_space<vmem>>, vector<1x1x16x4xf32>
    %202 = vector.shape_cast %201 : vector<1x1x16x4xf32> to vector<16x4xf32>
    %203 = arith.maximumf %200, %202 : vector<16x4xf32>
    %c0_i32_179 = arith.constant 0 : i32
    %204 = vector.broadcast %c0_i32_179 : i32 to vector<16x1xi32>
    %205 = arith.cmpi sge, %0, %204 : vector<16x1xi32>
    %c5_i32_180 = arith.constant 5 : i32
    %206 = vector.broadcast %c5_i32_180 : i32 to vector<16x1xi32>
    %207 = arith.cmpi slt, %0, %206 : vector<16x1xi32>
    %208 = arith.andi %205, %207 : vector<16x1xi1>
    %cst_181 = arith.constant 0xFF800000 : f32
    %209 = vector.shape_cast %208 : vector<16x1xi1> to vector<16x1xi1>
    %210 = vector.broadcast %209 : vector<16x1xi1> to vector<16x4xi1>
    %211 = vector.broadcast %cst_181 : f32 to vector<16x4xf32>
    %212 = arith.select %210, %203, %211 : vector<16x4xi1>, vector<16x4xf32>
    %cst_182 = arith.constant dense<0xFF800000> : vector<4xf32>
    %213 = vector.multi_reduction <maximumf>, %212, %cst_182 [0] : vector<16x4xf32> to vector<4xf32>
    %214 = vector.shape_cast %213 : vector<4xf32> to vector<1x4xf32>
    %c5_i32_183 = arith.constant 5 : i32
    %215 = vector.broadcast %c5_i32_183 : i32 to vector<16x1xi32>
    %216 = arith.cmpi sge, %0, %215 : vector<16x1xi32>
    %c11_i32_184 = arith.constant 11 : i32
    %217 = vector.broadcast %c11_i32_184 : i32 to vector<16x1xi32>
    %218 = arith.cmpi slt, %0, %217 : vector<16x1xi32>
    %219 = arith.andi %216, %218 : vector<16x1xi1>
    %cst_185 = arith.constant 0xFF800000 : f32
    %220 = vector.shape_cast %219 : vector<16x1xi1> to vector<16x1xi1>
    %221 = vector.broadcast %220 : vector<16x1xi1> to vector<16x4xi1>
    %222 = vector.broadcast %cst_185 : f32 to vector<16x4xf32>
    %223 = arith.select %221, %203, %222 : vector<16x4xi1>, vector<16x4xf32>
    %cst_186 = arith.constant dense<0xFF800000> : vector<4xf32>
    %224 = vector.multi_reduction <maximumf>, %223, %cst_186 [0] : vector<16x4xf32> to vector<4xf32>
    %225 = vector.shape_cast %224 : vector<4xf32> to vector<1x4xf32>
    %c11_i32_187 = arith.constant 11 : i32
    %226 = vector.broadcast %c11_i32_187 : i32 to vector<16x1xi32>
    %227 = arith.cmpi sge, %0, %226 : vector<16x1xi32>
    %c16_i32_188 = arith.constant 16 : i32
    %228 = vector.broadcast %c16_i32_188 : i32 to vector<16x1xi32>
    %229 = arith.cmpi slt, %0, %228 : vector<16x1xi32>
    %230 = arith.andi %227, %229 : vector<16x1xi1>
    %cst_189 = arith.constant 0xFF800000 : f32
    %231 = vector.shape_cast %230 : vector<16x1xi1> to vector<16x1xi1>
    %232 = vector.broadcast %231 : vector<16x1xi1> to vector<16x4xi1>
    %233 = vector.broadcast %cst_189 : f32 to vector<16x4xf32>
    %234 = arith.select %232, %203, %233 : vector<16x4xi1>, vector<16x4xf32>
    %cst_190 = arith.constant dense<0xFF800000> : vector<4xf32>
    %235 = vector.multi_reduction <maximumf>, %234, %cst_190 [0] : vector<16x4xf32> to vector<4xf32>
    %236 = vector.shape_cast %235 : vector<4xf32> to vector<1x4xf32>
    %c0_191 = arith.constant 0 : index
    %c11_192 = arith.constant 11 : index
    %c0_193 = arith.constant 0 : index
    %c0_194 = arith.constant 0 : index
    %237 = vector.load %arg2[%c0_191, %c11_192, %c0_193, %c0_194] : memref<1x16x16x4xf32, #tpu.memory_space<vmem>>, vector<1x1x16x4xf32>
    %238 = vector.shape_cast %237 : vector<1x1x16x4xf32> to vector<16x4xf32>
    %c0_195 = arith.constant 0 : index
    %c12_196 = arith.constant 12 : index
    %c0_197 = arith.constant 0 : index
    %c0_198 = arith.constant 0 : index
    %239 = vector.load %arg2[%c0_195, %c12_196, %c0_197, %c0_198] : memref<1x16x16x4xf32, #tpu.memory_space<vmem>>, vector<1x1x16x4xf32>
    %240 = vector.shape_cast %239 : vector<1x1x16x4xf32> to vector<16x4xf32>
    %241 = arith.maximumf %238, %240 : vector<16x4xf32>
    %c0_199 = arith.constant 0 : index
    %c13_200 = arith.constant 13 : index
    %c0_201 = arith.constant 0 : index
    %c0_202 = arith.constant 0 : index
    %242 = vector.load %arg2[%c0_199, %c13_200, %c0_201, %c0_202] : memref<1x16x16x4xf32, #tpu.memory_space<vmem>>, vector<1x1x16x4xf32>
    %243 = vector.shape_cast %242 : vector<1x1x16x4xf32> to vector<16x4xf32>
    %244 = arith.maximumf %241, %243 : vector<16x4xf32>
    %c0_203 = arith.constant 0 : index
    %c14_204 = arith.constant 14 : index
    %c0_205 = arith.constant 0 : index
    %c0_206 = arith.constant 0 : index
    %245 = vector.load %arg2[%c0_203, %c14_204, %c0_205, %c0_206] : memref<1x16x16x4xf32, #tpu.memory_space<vmem>>, vector<1x1x16x4xf32>
    %246 = vector.shape_cast %245 : vector<1x1x16x4xf32> to vector<16x4xf32>
    %247 = arith.maximumf %244, %246 : vector<16x4xf32>
    %c0_207 = arith.constant 0 : index
    %c15_208 = arith.constant 15 : index
    %c0_209 = arith.constant 0 : index
    %c0_210 = arith.constant 0 : index
    %248 = vector.load %arg2[%c0_207, %c15_208, %c0_209, %c0_210] : memref<1x16x16x4xf32, #tpu.memory_space<vmem>>, vector<1x1x16x4xf32>
    %249 = vector.shape_cast %248 : vector<1x1x16x4xf32> to vector<16x4xf32>
    %250 = arith.maximumf %247, %249 : vector<16x4xf32>
    %c0_i32_211 = arith.constant 0 : i32
    %251 = vector.broadcast %c0_i32_211 : i32 to vector<16x1xi32>
    %252 = arith.cmpi sge, %0, %251 : vector<16x1xi32>
    %c5_i32_212 = arith.constant 5 : i32
    %253 = vector.broadcast %c5_i32_212 : i32 to vector<16x1xi32>
    %254 = arith.cmpi slt, %0, %253 : vector<16x1xi32>
    %255 = arith.andi %252, %254 : vector<16x1xi1>
    %cst_213 = arith.constant 0xFF800000 : f32
    %256 = vector.shape_cast %255 : vector<16x1xi1> to vector<16x1xi1>
    %257 = vector.broadcast %256 : vector<16x1xi1> to vector<16x4xi1>
    %258 = vector.broadcast %cst_213 : f32 to vector<16x4xf32>
    %259 = arith.select %257, %250, %258 : vector<16x4xi1>, vector<16x4xf32>
    %cst_214 = arith.constant dense<0xFF800000> : vector<4xf32>
    %260 = vector.multi_reduction <maximumf>, %259, %cst_214 [0] : vector<16x4xf32> to vector<4xf32>
    %261 = vector.shape_cast %260 : vector<4xf32> to vector<1x4xf32>
    %c5_i32_215 = arith.constant 5 : i32
    %262 = vector.broadcast %c5_i32_215 : i32 to vector<16x1xi32>
    %263 = arith.cmpi sge, %0, %262 : vector<16x1xi32>
    %c11_i32_216 = arith.constant 11 : i32
    %264 = vector.broadcast %c11_i32_216 : i32 to vector<16x1xi32>
    %265 = arith.cmpi slt, %0, %264 : vector<16x1xi32>
    %266 = arith.andi %263, %265 : vector<16x1xi1>
    %cst_217 = arith.constant 0xFF800000 : f32
    %267 = vector.shape_cast %266 : vector<16x1xi1> to vector<16x1xi1>
    %268 = vector.broadcast %267 : vector<16x1xi1> to vector<16x4xi1>
    %269 = vector.broadcast %cst_217 : f32 to vector<16x4xf32>
    %270 = arith.select %268, %250, %269 : vector<16x4xi1>, vector<16x4xf32>
    %cst_218 = arith.constant dense<0xFF800000> : vector<4xf32>
    %271 = vector.multi_reduction <maximumf>, %270, %cst_218 [0] : vector<16x4xf32> to vector<4xf32>
    %272 = vector.shape_cast %271 : vector<4xf32> to vector<1x4xf32>
    %c11_i32_219 = arith.constant 11 : i32
    %273 = vector.broadcast %c11_i32_219 : i32 to vector<16x1xi32>
    %274 = arith.cmpi sge, %0, %273 : vector<16x1xi32>
    %c16_i32_220 = arith.constant 16 : i32
    %275 = vector.broadcast %c16_i32_220 : i32 to vector<16x1xi32>
    %276 = arith.cmpi slt, %0, %275 : vector<16x1xi32>
    %277 = arith.andi %274, %276 : vector<16x1xi1>
    %cst_221 = arith.constant 0xFF800000 : f32
    %278 = vector.shape_cast %277 : vector<16x1xi1> to vector<16x1xi1>
    %279 = vector.broadcast %278 : vector<16x1xi1> to vector<16x4xi1>
    %280 = vector.broadcast %cst_221 : f32 to vector<16x4xf32>
    %281 = arith.select %279, %250, %280 : vector<16x4xi1>, vector<16x4xf32>
    %cst_222 = arith.constant dense<0xFF800000> : vector<4xf32>
    %282 = vector.multi_reduction <maximumf>, %281, %cst_222 [0] : vector<16x4xf32> to vector<4xf32>
    %283 = vector.shape_cast %282 : vector<4xf32> to vector<1x4xf32>
    %284 = tpu.concatenate %49, %83, %94, %128, %139, %164, %175, %186, %214, %225, %236, %261, %272, %283 in 0 : vector<1x4xf32>, vector<1x4xf32>, vector<1x4xf32>, vector<1x4xf32>, vector<1x4xf32>, vector<1x4xf32>, vector<1x4xf32>, vector<1x4xf32>, vector<1x4xf32>, vector<1x4xf32>, vector<1x4xf32>, vector<1x4xf32>, vector<1x4xf32>, vector<1x4xf32> -> vector<14x4xf32>
    %c0_223 = arith.constant 0 : index
    %c0_224 = arith.constant 0 : index
    %c0_225 = arith.constant 0 : index
    %285 = vector.load %arg3[%c0_223, %c0_224, %c0_225] : memref<1x14x4xf32, #tpu.memory_space<vmem>>, vector<1x14x4xf32>
    %286 = vector.shape_cast %285 : vector<1x14x4xf32> to vector<14x4xf32>
    %287 = vector.shape_cast %284 : vector<14x4xf32> to vector<1x14x4xf32>
    tpu.vector_store %arg3[%c0_223, %c0_224, %c0_225], %287 {strides = array<i32>} : memref<1x14x4xf32, #tpu.memory_space<vmem>>, vector<1x14x4xf32>,
    return
  }
  func.func @transform_0(%arg0: i32, %arg1: i32) -> (i32, i32, i32, i32) {
    %c0_i32 = arith.constant 0 : i32
    %c0_i32_0 = arith.constant 0 : i32
    %c0_i32_1 = arith.constant 0 : i32
    return %arg0, %c0_i32, %c0_i32_0, %arg1 : i32, i32, i32, i32
  }
  func.func @transform_1(%arg0: i32, %arg1: i32) -> (i32, i32, i32) {
    %c0_i32 = arith.constant 0 : i32
    %c0_i32_0 = arith.constant 0 : i32
    return %arg0, %c0_i32, %arg1 : i32, i32, i32
  }
}

</mosaic_0001>

<bundles_post_ra>
// kernel: tpu_custom_call.1
= control target key start
LH: loop header
LB: loop body
LE: loop exit
PB: predicated region body
PF: predicated region fallthrough
CT: control target
= control target key end

     0   :  { %s665_s6 = smov 0   ;;  %s667_s7 = smov 0   ;;  %s900_s0 = inlined_call_operand.vmem [shape: f32[2,16,16,4], index: 0, kind: input, shape index: {}]   ;;  %s901_s1 = inlined_call_operand.vmem [shape: f32[2,14,4], index: 1, kind: output, shape index: {}]  }
   0x1   :  { %s669_s8 = smov 0  }
   0x2 LB: > { %s23_s9 = sadd.s32 1, %s649_s7  ;;  %p568_p0 = scmp.ge.s32.totalorder %s653_s8, 1  ;;  %s653_s8 = sphi %s669_s8, %s11_s8   ;;  %s649_s7 = sphi %s667_s7, %s903_s7   ;;  %s645_s6 = sphi %s665_s6, %s902_s6  }
   0x3   : > { %p25_p1 = scmp.ge.s32.totalorder %s23_s9, 2  ;;  %p106_p2 = scmp.lt.s32.totalorder %s653_s8, 3 }
   0x5   : > { %s905_s9 = smov (%p25_p1, %s23_s9), 0  ;;  %p107_p3 = pnand %p568_p0, %p106_p2 }
   0x6   : > { %p132_p4 = scmp.lt.s32.totalorder (!%p107_p3), %s645_s6, 1  ;;  %v148_v0 = vlaneseq (!%p107_p3)  ;;  %vm228_vm0 = vcmask (!%p107_p3), 31744   ;;  %vm459_vm5 = vcmask (!%p107_p3), 1040384   ;;  %vm461_vm6 = vcmask (!%p107_p3), 1041408  }
   0x7   : > { %110 = sbr.rel (%p107_p3) target bundleno = 77 (0x4d), region = 24  ;;  %vm463_vm7 = vcmask (!%p107_p3), 1042432   ;;  %vm465_vm8 = vcmask (!%p107_p3), 1043456   ;;  %vm467_vm9 = vcmask (!%p107_p3), 1044480   ;;  %vm469_vm10 = vcmask (!%p107_p3), 1045504  }
   0x8   : > { %v691_v1 = vshrl.u32 (!%p107_p3), %v148_v0, 7  ;;  %vm471_vm11 = vcmask (!%p107_p3), 1046528   ;;  %vm479_vm12 = vcmask (!%p107_p3), 29696  }
   0xa   : > { %v702_v13 = vadd.s32 (!%p107_p3), 8, %v691_v1  ;;  %vm316_vm1 = vcmp.lt.s32.totalorder (!%p107_p3), %v691_v1, 5  ;;  %vm335_vm2 = vcmp.ge.s32.totalorder (!%p107_p3), %v691_v1, 5 }
   0xc   : > { %vm338_vm3 = vcmp.lt.s32.totalorder (!%p107_p3), %v702_v13, 11  ;;  %vm357_vm4 = vcmp.ge.s32.totalorder (!%p107_p3), %v702_v13, 11 }
   0xe   : > { %s907_s6 = smov (!%p132_p4, %s645_s6), 1 }
   0xf   : > { %s605_s10 = sshll.u32 %s907_s6, 8  ;;  %s606_s14 = sshll.u32 %s907_s6, 4 }
  0x10   : > { %s689_s13 = scalar_lea.vmem %s900_s0, %s605_s10  ;;  %s147_s17 = scalar_lea.vmem %s901_s1, %s606_s14 }
  0x11   : > { %v151_v2 = vld [vmem:[%s689_s13] sm:$0xff]  ;;  %v152_v3 = vld [vmem:[%s689_s13 + $0x8] sm:$0xff]  ;;  %v573_v4 = vld [vmem:[%s689_s13 + $0x10] sm:$0xff] }
  0x12   : > { %v574_v5 = vld [vmem:[%s689_s13 + $0x18] sm:$0xff]  ;;  %v156_v6 = vmax.f32 %v151_v2, %v573_v4  ;;  %v575_v7 = vld [vmem:[%s689_s13 + $0x20] sm:$0xff]  ;;  %v576_v8 = vld [vmem:[%s689_s13 + $0x28] sm:$0xff] }
  0x13   : > { %v157_v9 = vmax.f32 %v152_v3, %v574_v5  ;;  %v577_v10 = vld [vmem:[%s689_s13 + $0x30] sm:$0xff]  ;;  %v578_v12 = vld [vmem:[%s689_s13 + $0x38] sm:$0xff]  ;;  %v579_v15 = vld [vmem:[%s689_s13 + $0x40] sm:$0xff] }
  0x14   : > { %v161_v11 = vmax.f32 %v156_v6, %v575_v7  ;;  %v580_v17 = vld [vmem:[%s689_s13 + $0x48] sm:$0xff]  ;;  %v581_v18 = vld [vmem:[%s689_s13 + $0x50] sm:$0xff]  ;;  %v708_v19 = vld [vmem:[%s689_s13 + $0x80] sm:$0xff] }
  0x15   : > { %v162_v14 = vmax.f32 %v157_v9, %v576_v8  ;;  %v711_v21 = vld [vmem:[%s689_s13 + $0x88] sm:$0xff]  ;;  %v714_v22 = vld [vmem:[%s689_s13 + $0x90] sm:$0xff]  ;;  %v717_v23 = vld [vmem:[%s689_s13 + $0x98] sm:$0xff] }
  0x16   : > { %v166_v16 = vmax.f32 %v161_v11, %v577_v10  ;;  %v720_v25 = vld [vmem:[%s689_s13 + $0x58] sm:$0xff]  ;;  %v583_v26 = vld [vmem:[%s689_s13 + $0x60] sm:$0xff]  ;;  %v280_v27 = vmax.f32 %v708_v19, %v714_v22  ;;  %v281_v28 = vmax.f32 %v711_v21, %v717_v23  ;;  %v732_v31 = vld [vmem:[%s689_s13 + $0xa8] sm:$0xff] }
  0x17   : > { %v167_v20 = vmax.f32 %v162_v14, %v578_v12  ;;  %v729_v30 = vld [vmem:[%s689_s13 + $0xa0] sm:$0xff]  ;;  %v375_v32 = vmax.f32 %v581_v18, %v583_v26  ;;  %v737_v34 = vld [vmem:[%s689_s13 + $0x68] sm:$0xff]  ;;  %v585_v39 = vld [vmem:[%s689_s13 + $0x70] sm:$0xff] }
  0x18   : > { %v171_v24 = vmax.f32 %v166_v16, %v579_v15  ;;  %v282_v35 = vmax.f32 %v280_v27, %v729_v30  ;;  %v283_v36 = vmax.f32 %v281_v28, %v732_v31  ;;  %v746_v40 = vld [vmem:[%s689_s13 + $0xb0] sm:$0xff]  ;;  %v749_v41 = vld [vmem:[%s689_s13 + $0xb8] sm:$0xff]  ;;  %v761_v51 = vld [vmem:[%s689_s13 + $0xc0] sm:$0xff]  ;;  %v376_v63 = vmax.f32 %v720_v25, %v737_v34 }
  0x19   : > { %v172_v29 = vmax.f32 %v167_v20, %v580_v17  ;;  %v586_v46 = vld [vmem:[%s689_s13 + $0x78] sm:$0xff]  ;;  %v764_v52 = vld [vmem:[%s689_s13 + $0xc8] sm:$0xff]  ;;  %v772_v60 = vld [vmem:[%s689_s13 + $0xd0] sm:$0xff]  ;;  %v377_v0 = vmax.f32 %v375_v32, %v585_v39 }
  0x1a   : > { %v176_v33 = vmax.f32 %v171_v24, %v581_v18  ;;  %v324_v37 = vsel %vm316_vm1, %v171_v24, -inf  ;;  %v345_v43 = vsel %vm335_vm2, %v171_v24, -inf  ;;  %v284_v47 = vmax.f32 %v282_v35, %v746_v40  ;;  %v775_v61 = vld [vmem:[%s689_s13 + $0xd8] sm:$0xff]  ;;  %v785_v7 = vld [vmem:[%s689_s13 + $0xe0] sm:$0xff]  ;;  %v788_v8 = vld [vmem:[%s689_s13 + $0xe8] sm:$0xff] }
  0x1b   : > { %v177_v38 = vmax.f32 %v172_v29, %v720_v25  ;;  %v326_v42 = vsel %vm228_vm0, %v324_v37, -inf  ;;  %v346_v44 = vsel %vm338_vm3, %v172_v29, -inf  ;;  %v285_v48 = vmax.f32 %v283_v36, %v749_v41  ;;  %v796_v18 = vld [vmem:[%s689_s13 + $0xf0] sm:$0xff]  ;;  %v799_v20 = vld [vmem:[%s689_s13 + $0xf8] sm:$0xff] }
  0x1c   : > { %v181_v45 = vmax.f32 %v176_v33, %v583_v26  ;;  %v329_v49 = vrot.slane %v326_v42, 4  ;;  %v347_v53 = vsel %vm228_vm0, %v345_v43, -inf  ;;  %v348_v54 = vsel %vm228_vm0, %v346_v44, -inf }
  0x1d   : > { %v182_v50 = vmax.f32 %v177_v38, %v737_v34  ;;  %v286_v56 = vmax.f32 %v284_v47, %v761_v51  ;;  %v287_v57 = vmax.f32 %v285_v48, %v764_v52  ;;  %v349_v62 = vmax.f32 %v347_v53, %v348_v54 }
  0x1e   : > { %v186_v55 = vmax.f32 %v181_v45, %v585_v39  ;;  %v330_v58 = vmax.f32 %v326_v42, %v329_v49  ;;  %v365_v26 = vsel %vm357_vm4, %v172_v29, -inf }
  0x1f   : > { %v187_v59 = vmax.f32 %v182_v50, %v586_v46  ;;  %v288_v4 = vmax.f32 %v286_v56, %v772_v60  ;;  %v289_v5 = vmax.f32 %v287_v57, %v775_v61  ;;  %v350_v25 = vrot.slane %v349_v62, 4 }
  0x20   : > { %v191_v2 = vmax.f32 %v186_v55, %v708_v19  ;;  %v250_v3 = vsel %vm228_vm0, %v186_v55, -inf  ;;  %v331_v11 = vrot.slane %v330_v58, 2  ;;  %v367_v54 = vsel %vm228_vm0, %v365_v26, -inf }
  0x21   : > { %v192_v6 = vmax.f32 %v187_v59, %v711_v21  ;;  %v253_v9 = vrot.slane %v250_v3, 4  ;;  %v272_v10 = vsel %vm228_vm0, %v187_v59, -inf  ;;  %v290_v15 = vmax.f32 %v288_v4, %v785_v7 }
  0x22   : > { %v196_v12 = vmax.f32 %v191_v2, %v714_v22  ;;  %v274_v14 = vrot.slane %v272_v10, 4  ;;  %v291_v16 = vmax.f32 %v289_v5, %v788_v8  ;;  %v332_v36 = vmax.f32 %v330_v58, %v331_v11 }
  0x23   : > { %v197_v17 = vmax.f32 %v192_v6, %v717_v23  ;;  %v254_v24 = vmax.f32 %v250_v3, %v253_v9  ;;  %v292_v32 = vmax.f32 %v290_v15, %v796_v18  ;;  %v351_v37 = vmax.f32 %v349_v62, %v350_v25 }
  0x24   : > { %v201_v27 = vmax.f32 %v196_v12, %v729_v30  ;;  %v275_v28 = vmax.f32 %v272_v10, %v274_v14  ;;  %v293_v33 = vmax.f32 %v291_v16, %v799_v20  ;;  %v378_v55 = vmax.f32 %v376_v63, %v586_v46 }
  0x25   : > { %v202_v34 = vmax.f32 %v197_v17, %v732_v31  ;;  %v255_v35 = vrot.slane %v254_v24, 2  ;;  %v296_v42 = vsel %vm228_vm0, %v292_v32, -inf  ;;  %v333_v58 = vrot.slane %v332_v36, 1 }
  0x26   : > { %v206_v38 = vmax.f32 %v201_v27, %v746_v40  ;;  %v276_v39 = vrot.slane %v275_v28, 2  ;;  %v308_v43 = vsel %vm228_vm0, %v293_v33, -inf  ;;  %v299_v45 = vrot.slane %v296_v42, 4 }
  0x27   : > { %v207_v29 = vmax.f32 %v202_v34, %v749_v41  ;;  %v256_v44 = vmax.f32 %v254_v24, %v255_v35  ;;  %v310_v47 = vrot.slane %v308_v43, 4  ;;  %v379_v59 = vmax.f32 %v377_v0, %v708_v19 }
  0x28   : > { %v211_v48 = vmax.f32 %v206_v38, %v761_v51  ;;  %v277_v49 = vmax.f32 %v275_v28, %v276_v39  ;;  %v300_v53 = vmax.f32 %v296_v42, %v299_v45  ;;  %v352_v3 = vrot.slane %v351_v37, 2 }
  0x29   : > { %v212_v50 = vmax.f32 %v207_v29, %v764_v52  ;;  %v311_v57 = vmax.f32 %v308_v43, %v310_v47  ;;  %v257_v2 = vrot.slane %v256_v44, 1  ;;  %v369_v6 = vrot.slane %v367_v54, 4 }
  0x2a   : > { %v216_v56 = vmax.f32 %v211_v48, %v772_v60  ;;  %v278_v5 = vrot.slane %v277_v49, 1  ;;  %v301_v10 = vrot.slane %v300_v53, 2  ;;  %v380_v11 = vmax.f32 %v378_v55, %v711_v21 }
  0x2b   : > { %v217_v62 = vmax.f32 %v212_v50, %v775_v61  ;;  %v312_v63 = vrot.slane %v311_v57, 2  ;;  %v821_v12 = vmax.f32 %v332_v36, %v333_v58  ;;  %v381_v19 = vmax.f32 %v379_v59, %v714_v22 }
  0x2c   : > { %v221_v4 = vmax.f32 %v216_v56, %v785_v7  ;;  %v825_v14 = vmax.f32 %v256_v44, %v257_v2  ;;  %v827_v15 = vmax.f32 %v351_v37, %v352_v3  ;;  %v382_v16 = vmax.f32 %v380_v11, %v717_v23 }
  0x2d   : > { %v222_v9 = vmax.f32 %v217_v62, %v788_v8  ;;  %v831_v24 = vmax.f32 %v277_v49, %v278_v5  ;;  %v370_v21 = vmax.f32 %v367_v54, %v369_v6  ;;  %v383_v25 = vmax.f32 %v381_v19, %v729_v30 }
  0x2e   : > { %v226_v46 = vmax.f32 %v221_v4, %v796_v18  ;;  %v302_v27 = vmax.f32 %v300_v53, %v301_v10  ;;  %v384_v22 = vmax.f32 %v382_v16, %v732_v31  ;;  %v418_v28 = vmax.f32 %v746_v40, %v761_v51 }
  0x2f   : > { %v227_v0 = vmax.f32 %v222_v9, %v799_v20  ;;  %v313_v33 = vmax.f32 %v311_v57, %v312_v63  ;;  %v385_v23 = vsel %vm316_vm1, %v383_v25, -inf  ;;  %v396_v34 = vsel %vm335_vm2, %v383_v25, -inf }
  0x30   : > { %v229_v17 = vsel %vm228_vm0, %v226_v46, -inf  ;;  %v387_v35 = vsel %vm228_vm0, %v385_v23, -inf  ;;  %v397_v30 = vsel %vm338_vm3, %v384_v22, -inf  ;;  %v398_v36 = vsel %vm228_vm0, %v396_v34, -inf }
  0x31   : > { %v230_v26 = vsel %vm228_vm0, %v227_v0, -inf  ;;  %v408_v31 = vsel %vm357_vm4, %v384_v22, -inf  ;;  %v371_v40 = vrot.slane %v370_v21, 2  ;;  %v390_v51 = vrot.slane %v387_v35, 4 }
  0x32   : > { %v231_v32 = vmax.f32 %v229_v17, %v230_v26  ;;  %v399_v38 = vsel %vm228_vm0, %v397_v30, -inf  ;;  %v410_v42 = vsel %vm228_vm0, %v408_v31, -inf  ;;  %v419_v43 = vmax.f32 %v749_v41, %v764_v52 }
  0x33   : > { %v400_v39 = vmax.f32 %v398_v36, %v399_v38  ;;  %v420_v29 = vmax.f32 %v418_v28, %v772_v60  ;;  %v303_v45 = vrot.slane %v302_v27, 1  ;;  %v391_v47 = vmax.f32 %v387_v35, %v390_v51 }
  0x34   : > { %v232_v37 = vrot.slane %v231_v32, 4  ;;  %v412_v48 = vrot.slane %v410_v42, 4  ;;  %v354_v49 = vrot.slane %v827_v15, 1  ;;  %v421_v53 = vmax.f32 %v419_v43, %v775_v61 }
  0x35   : > { %v401_v50 = vrot.slane %v400_v39, 4  ;;  %v422_v54 = vmax.f32 %v420_v29, %v785_v7  ;;  %v314_v56 = vrot.slane %v313_v33, 1  ;;  %v392_v57 = vrot.slane %v391_v47, 2 }
  0x36   : > { %v233_v44 = vmax.f32 %v231_v32, %v232_v37  ;;  %v413_v58 = vmax.f32 %v410_v42, %v412_v48  ;;  %v372_v41 = vmax.f32 %v370_v21, %v371_v40  ;;  %v423_v60 = vmax.f32 %v421_v53, %v788_v8 }
  0x37   : > { %v402_v52 = vmax.f32 %v400_v39, %v401_v50  ;;  %v424_v59 = vmax.f32 %v422_v54, %v796_v18  ;;  %v304_v2 = vmax.f32 %v302_v27, %v303_v45  ;;  %v393_v3 = vmax.f32 %v391_v47, %v392_v57 }
  0x38   : > { %v234_v55 = vrot.slane %v233_v44, 2  ;;  %v414_v4 = vrot.slane %v413_v58, 2  ;;  %v425_v7 = vmax.f32 %v423_v60, %v799_v20  ;;  %v373_v0 = vrot.slane %v372_v41, 1 }
  0x39   : > { %v403_v61 = vrot.slane %v402_v52, 2  ;;  %v426_v5 = vsel %vm316_vm1, %v424_v59, -inf  ;;  %v437_v6 = vsel %vm335_vm2, %v424_v59, -inf  ;;  %v394_v8 = vrot.slane %v393_v3, 1 }
  0x3a   : > { %v235_v62 = vmax.f32 %v233_v44, %v234_v55  ;;  %v415_v10 = vmax.f32 %v413_v58, %v414_v4  ;;  %v428_v18 = vsel %vm228_vm0, %v426_v5, -inf  ;;  %v438_v63 = vsel %vm338_vm3, %v425_v7, -inf }
  0x3b   : > { %v404_v11 = vmax.f32 %v402_v52, %v403_v61  ;;  %v431_v46 = vrot.slane %v428_v18, 4  ;;  %v439_v19 = vsel %vm228_vm0, %v437_v6, -inf  ;;  %v440_v1 = vsel %vm228_vm0, %v438_v63, -inf }
  0x3c   : > { %v236_v9 = vrot.slane %v235_v62, 1  ;;  %v416_v16 = vrot.slane %v415_v10, 1  ;;  %v441_v25 = vmax.f32 %v439_v19, %v440_v1  ;;  %v449_v26 = vsel %vm357_vm4, %v425_v7, -inf }
  0x3d   : > { %v405_v17 = vrot.slane %v404_v11, 1  ;;  %v432_v21 = vmax.f32 %v428_v18, %v431_v46  ;;  %v315_v27 = vmax.f32 %v313_v33, %v314_v56  ;;  %v395_v22 = vmax.f32 %v393_v3, %v394_v8 }
  0x3e   : > { %v237_v20 = vmax.f32 %v235_v62, %v236_v9  ;;  %v451_v28 = vsel %vm228_vm0, %v449_v26, -inf  ;;  %v442_v35 = vrot.slane %v441_v25, 4  ;;  %v355_v36 = vmax.f32 %v827_v15, %v354_v49 }
  0x3f   : > { %v406_v23 = vmax.f32 %v404_v11, %v405_v17  ;;  %v433_v34 = vrot.slane %v432_v21, 2  ;;  %v453_v30 = vrot.slane %v451_v28, 4  ;;  %v374_v31 = vmax.f32 %v372_v41, %v373_v0 }
  0x40   : > { %v460_v32 = vsel %vm459_vm5, %v237_v20, %v825_v14  ;;  %v417_v37 = vmax.f32 %v415_v10, %v416_v16  ;;  %v443_v33 = vmax.f32 %v441_v25, %v442_v35 }
  0x41   : > { %v462_v13 = vsel %vm461_vm6, %v460_v32, %v831_v24  ;;  %v434_v40 = vmax.f32 %v432_v21, %v433_v34  ;;  %v454_v51 = vmax.f32 %v451_v28, %v453_v30  ;;  %v473_v14 = vsel %vm459_vm5, %v395_v22, %v406_v23 }
  0x42   : > { %v464_v38 = vsel %vm463_vm7, %v462_v13, %v304_v2  ;;  %v444_v42 = vrot.slane %v443_v33, 2  ;;  %v474_v44 = vsel %vm461_vm6, %v473_v14, %v417_v37 }
  0x43   : > { %v466_v39 = vsel %vm465_vm8, %v464_v38, %v315_v27  ;;  %v435_v15 = vrot.slane %v434_v40, 1  ;;  %v455_v43 = vrot.slane %v454_v51, 2 }
  0x44   : > { %v468_v24 = vsel %vm467_vm9, %v466_v39, %v821_v12  ;;  %v445_v47 = vmax.f32 %v443_v33, %v444_v42 }
  0x45   : > { %v470_v29 = vsel %vm469_vm10, %v468_v24, %v355_v36  ;;  %v436_v45 = vmax.f32 %v434_v40, %v435_v15  ;;  %v456_v48 = vmax.f32 %v454_v51, %v455_v43 }
  0x46   : > { %v472_v49 = vsel %vm471_vm11, %v470_v29, %v374_v31  ;;  %v446_v50 = vrot.slane %v445_v47, 1 }
  0x47   : > { %478 = vst.msk [vmem:[%s147_s17] sm:$0xff] %vm228_vm0, %v472_v49  ;;  %v457_v53 = vrot.slane %v456_v48, 1  ;;  %v475_v54 = vsel %vm463_vm7, %v474_v44, %v436_v45 }
  0x48   : > { %v447_v55 = vmax.f32 %v445_v47, %v446_v50 }
  0x49   : > { %v458_v56 = vmax.f32 %v456_v48, %v457_v53 }
  0x4a   : > { %v476_v57 = vsel %vm465_vm8, %v475_v54, %v447_v55 }
  0x4b   : > { %v477_v12 = vsel %vm467_vm9, %v476_v57, %v458_v56 }
  0x4c   : > { %480 = vst.msk [vmem:[%s147_s17 + $0x8] sm:$0x3f] %vm479_vm12, %v477_v12 }
  0x4d PF: > { %s11_s8 = sadd.s32 1, %s653_s8   ;;  %s902_s6 = smov %s649_s7 }
  0x4e   : > { %p8_p5 = scmp.ge.s32.totalorder %s11_s8, 4   ;;  %s903_s7 = smov %s905_s9 }
  0x50   :  { %10 = sbr.rel (!%p8_p5) target bundleno = 2 (0x2), region = 69 }

</bundles_post_ra>
